<compile_context>
chip_gen: v6e
topology: v6e:2x2x1
jax: 0.10.0
libtpu: 0.0.40
codegen_flags: <defaults>
</compile_context>

<pallas_src>
import functools

import jax
import jax.numpy as jnp
import numpy as np
from jax.experimental import pallas as pl
from jax.experimental.pallas import tpu as pltpu

LANE = 128


def _top_kernel(x_ref, w_ref, b_ref, o_ref, *, hw_inv):
    # x_ref: (TB, C, HW)   w_ref: (C, Np)   b_ref: (1, Np)   o_ref: (TB, Np)
    # Global average pool over the spatial (lane) axis -> (TB, C).
    pooled = jnp.sum(x_ref[...], axis=2) * hw_inv
    # Dropout: identity in inference mode (see TODO at top of file).
    logits = jnp.dot(pooled, w_ref[...],
                     preferred_element_type=jnp.float32)      # MXU, (TB, Np)
    o_ref[...] = logits + b_ref[...]


def single_char_top_pallas(x_nchw, weight, bias, *, tile_budget_bytes=8 << 20):
    """x_nchw: (B, C, H, W) f32; weight: (nclasses, C); bias: (nclasses,)."""
    x = x_nchw.astype(jnp.float32)
    B, C, H, W = x.shape
    nclasses = weight.shape[0]
    HW = H * W

    # ---- batch tiling (grid axis; BlockSpec pipeline double-buffers it) ----
    elem_bytes = C * HW * 4
    if B * elem_bytes <= tile_budget_bytes:
        TB = B                                   # single grid step, no batch pad
    else:
        # keep the output block sublane-aligned when the grid has >1 step
        TB = max(8, (tile_budget_bytes // elem_bytes) // 8 * 8)
    Bp = pl.cdiv(B, TB) * TB

    x3 = x.reshape(B, C, HW)                     # contiguous reshape: free
    if Bp != B:
        x3 = jnp.pad(x3, ((0, Bp - B), (0, 0), (0, 0)))

    # ---- lane-dense classifier: pad class dim up to a multiple of 128 ----
    Np = pl.cdiv(nclasses, LANE) * LANE
    wt = jnp.transpose(weight.astype(jnp.float32), (1, 0))      # (C, nclasses)
    wt = jnp.pad(wt, ((0, 0), (0, Np - nclasses)))
    bp = jnp.pad(bias.astype(jnp.float32), (0, Np - nclasses)).reshape(1, Np)

    grid = (Bp // TB,)
    kernel = functools.partial(_top_kernel, hw_inv=1.0 / float(HW))

    # explicit VMEM budget: double-buffered x tile + resident weights + out
    vmem_need = (2 * TB * C * HW * 4
                 + 2 * (C * Np + Np) * 4
                 + 2 * TB * Np * 4
                 + (2 << 20))
    vmem_limit = min(48 << 20, max(16 << 20, int(vmem_need)))

    out = pl.pallas_call(
        kernel,
        out_shape=jax.ShapeDtypeStruct((Bp, Np), jnp.float32),
        grid=grid,
        in_specs=[
            pl.BlockSpec((TB, C, HW), lambda i: (i, 0, 0)),      # streamed tile
            pl.BlockSpec((C, Np), lambda i: (0, 0)),             # resident weight
            pl.BlockSpec((1, Np), lambda i: (0, 0)),             # resident bias
        ],
        out_specs=pl.BlockSpec((TB, Np), lambda i: (i, 0)),
        compiler_params=pltpu.CompilerParams(
            dimension_semantics=("parallel",),                   # 2 TCs on v7x
            vmem_limit_bytes=vmem_limit),
    )(x3, wt, bp)

    return out[:B, :nclasses]


# ------------- pure-JAX reference (eval-mode dropout = identity) -------------
def single_char_top_ref(x, weight, bias):
    pooled = x.mean(axis=(2, 3))                                 # adaptive_avg_pool2d -> (1,1)
    return jnp.dot(pooled, weight.T,
                   precision=jax.lax.Precision.HIGHEST) + bias   # Linear


if __name__ == "__main__":
    B, C, H, W = 2, 256, 16, 16          # input_channels=256 (per module docstring)
    nclasses = 36                        # single-character classes (e.g. alnum)

    key = jax.random.PRNGKey(0)
    kx, kw, kb = jax.random.split(key, 3)
    x = jax.random.normal(kx, (B, C, H, W), jnp.float32)
    weight = 0.1 * jax.random.normal(kw, (nclasses, C), jnp.float32)
    bias = 0.1 * jax.random.normal(kb, (nclasses,), jnp.float32)

    out = single_char_top_pallas(x, weight, bias)
    out = jax.block_until_ready(out)

    ref = jax.block_until_ready(single_char_top_ref(x, weight, bias))
    assert out.shape == ref.shape, (out.shape, ref.shape)
    np.testing.assert_allclose(np.asarray(out), np.asarray(ref),
                               rtol=5e-3, atol=5e-3)

    print("KERNEL_OK")
</pallas_src>

<mosaic_0001>
module attributes {stable_mosaic.version = 11 : i64} {
  func.func @_top_kernel(%arg0: i32, %arg1: memref<2x256x256xf32, #tpu.memory_space<vmem>>, %arg2: memref<256x128xf32, #tpu.memory_space<vmem>>, %arg3: memref<1x128xf32, #tpu.memory_space<vmem>>, %arg4: memref<2x128xf32, #tpu.memory_space<vmem>>) attributes {dimension_semantics = [#tpu.dimension_semantics<parallel>], iteration_bounds = array<i64: 1>, scalar_prefetch = 0 : i64, scratch_operands = 0 : i64, tpu.core_type = #tpu.core_type<tc>, window_params = [{transform_indices = @transform_0, window_bounds = array<i64: 2, 256, 256>}, {pipeline_mode = #tpu.pipeline_mode<synchronous>, transform_indices = @transform_1, window_bounds = array<i64: 256, 128>}, {pipeline_mode = #tpu.pipeline_mode<synchronous>, transform_indices = @transform_2, window_bounds = array<i64: 1, 128>}, {transform_indices = @transform_3, window_bounds = array<i64: 2, 128>}]} {
    %c0 = arith.constant 0 : index
    %c0_0 = arith.constant 0 : index
    %c0_1 = arith.constant 0 : index
    %0 = vector.load %arg1[%c0, %c0_0, %c0_1] : memref<2x256x256xf32, #tpu.memory_space<vmem>>, vector<2x256x256xf32>
    %cst = arith.constant dense<0.000000e+00> : vector<2x256xf32>
    %1 = vector.multi_reduction <add>, %0, %cst [2] : vector<2x256x256xf32> to vector<2x256xf32>
    %cst_2 = arith.constant 3.906250e-03 : f32
    %2 = vector.broadcast %cst_2 : f32 to vector<2x256xf32>
    %3 = arith.mulf %1, %2 : vector<2x256xf32>
    %c0_3 = arith.constant 0 : index
    %c0_4 = arith.constant 0 : index
    %4 = vector.load %arg2[%c0_3, %c0_4] : memref<256x128xf32, #tpu.memory_space<vmem>>, vector<256x128xf32>
    %cst_5 = arith.constant dense<0.000000e+00> : vector<2x128xf32>
    %5 = tpu.matmul %3, %4, %cst_5 {dimension_numbers = #tpu.dot_dimension_numbers<[1], [0], [0], [1], [0, 0, 1, 1], [], []>} : vector<2x256xf32>, vector<256x128xf32>, vector<2x128xf32> -> vector<2x128xf32>
    %c0_6 = arith.constant 0 : index
    %c0_7 = arith.constant 0 : index
    %6 = vector.load %arg3[%c0_6, %c0_7] : memref<1x128xf32, #tpu.memory_space<vmem>>, vector<1x128xf32>
    %7 = vector.broadcast %6 : vector<1x128xf32> to vector<2x128xf32>
    %8 = arith.addf %5, %7 : vector<2x128xf32>
    %c0_8 = arith.constant 0 : index
    %c0_9 = arith.constant 0 : index
    %9 = vector.load %arg4[%c0_8, %c0_9] : memref<2x128xf32, #tpu.memory_space<vmem>>, vector<2x128xf32>
    tpu.vector_store %arg4[%c0_8, %c0_9], %8 {strides = array<i32>} : memref<2x128xf32, #tpu.memory_space<vmem>>, vector<2x128xf32>,
    return
  }
  func.func @transform_0(%arg0: i32) -> (i32, i32, i32) {
    %c0_i32 = arith.constant 0 : i32
    %c0_i32_0 = arith.constant 0 : i32
    %c0_i32_1 = arith.constant 0 : i32
    return %arg0, %c0_i32, %c0_i32_0 : i32, i32, i32
  }
  func.func @transform_1(%arg0: i32) -> (i32, i32) {
    %c0_i32 = arith.constant 0 : i32
    %c0_i32_0 = arith.constant 0 : i32
    %c0_i32_1 = arith.constant 0 : i32
    return %c0_i32, %c0_i32_0 : i32, i32
  }
  func.func @transform_2(%arg0: i32) -> (i32, i32) {
    %c0_i32 = arith.constant 0 : i32
    %c0_i32_0 = arith.constant 0 : i32
    %c0_i32_1 = arith.constant 0 : i32
    return %c0_i32, %c0_i32_0 : i32, i32
  }
  func.func @transform_3(%arg0: i32) -> (i32, i32) {
    %c0_i32 = arith.constant 0 : i32
    %c0_i32_0 = arith.constant 0 : i32
    return %arg0, %c0_i32 : i32, i32
  }
}

</mosaic_0001>

<bundles_post_ra>
// kernel: tpu_custom_call.1
= control target key start
LH: loop header
LB: loop body
LE: loop exit
PB: predicated region body
PF: predicated region fallthrough
CT: control target
= control target key end

     0   :  { %8 = vsyncpa [#allocation3], 0  ;;  %s1327_s0 = inlined_call_operand.hbm [shape: f32[2,256,256], index: 0, kind: input, shape index: {}]   ;;  %s1328_s1 = inlined_call_operand.hbm [shape: f32[256,128], index: 1, kind: input, shape index: {}]   ;;  %s1329_s2 = inlined_call_operand.vmem [shape: f32[1,128], index: 2, kind: input, shape index: {}]   ;;  %s1330_s3 = inlined_call_operand.hbm [shape: f32[2,128], index: 3, kind: output, shape index: {}]  }
   0x1   :  { %9 = vsyncpa [#allocation6], 0 }
   0x2   :  { %10 = vsyncpa [#allocation4], 0  ;;  %s1079_s12 = smov [#allocation2]  }
   0x3   :  { %s16_s13 = sshll.u32 %s1079_s12, 4  ;;  %s17_s13 = int_to_ptr.vmem [resolvable:$true] %s16_s13 }
   0x4   :  { %s1021_s14 = scalar_lea.vmem %s17_s13, 16384  ;;  %p1026_p1 = scmp.lt.s32.totalorder %s17_s13, %s17_s13 }
   0x5   :  { %p1022_p0 = scmp.ne.s32.totalorder %s17_s13, %s1021_s14  ;;  %p1027_p2 = scmp.lt.s32.totalorder %s1021_s14, %s1021_s14 }
   0x7   :  { %p1028_p3 = por %p1027_p2, %p1026_p1 }
   0x9   :  { %p1029_p4 = pnand %p1028_p3, %p1022_p0 }
   0xb   :  { %1032 = shalt.err (!%p1029_p4)
}
   0xc   :  { %s1080_s15 = smov 256   ;;  %s1081_s16 = smov 16  }
   0xd   :  { %22 = dma.hbm_to_vmem [thread:$0]  %s1327_s0, 16384, %s17_s13, [#allocation3], %s1080_s15, %s1080_s15, %s1081_s16  }
   0xe   :  { %s1082_s19 = smov [#allocation5]  }
   0xf   :  { %s28_s20 = sshll.u32 %s1082_s19, 4  ;;  %s29_s20 = int_to_ptr.vmem [resolvable:$true] %s28_s20 }
  0x10   :  { %s1041_s21 = scalar_lea.vmem %s29_s20, 4096  ;;  %p1046_p6 = scmp.lt.s32.totalorder %s29_s20, %s29_s20 }
  0x11   :  { %p1042_p5 = scmp.ne.s32.totalorder %s29_s20, %s1041_s21  ;;  %p1047_p7 = scmp.lt.s32.totalorder %s1041_s21, %s1041_s21 }
  0x13   :  { %p1048_p8 = por %p1047_p7, %p1046_p6 }
  0x15   :  { %p1049_p9 = pnand %p1048_p8, %p1042_p5 }
  0x17   :  { %1052 = shalt.err (!%p1049_p9)
}
  0x18   :  { %s1083_s22 = smov 128   ;;  %s1084_s23 = smov 8  }
  0x19   :  { %34 = dma.hbm_to_vmem [thread:$0]  %s1328_s1, 4096, %s29_s20, [#allocation6], %s1083_s22, %s1083_s22, %s1084_s23  }
  0x1a   :  { %1073 = dma.done.wait [#allocation3], 16384  }
  0x1b   :  { %1074 = vsyncadd [#allocation3], 4294950912 }
  0x1c   :  { %1075 = dma.done.wait [#allocation6], 4096  }
  0x1d   :  { %1076 = vsyncadd [#allocation6], 4294963200  ;;  %v139_v0 = vld [vmem:[#allocation2 + $0x300] sm:$0xff]  ;;  %v140_v1 = vld [vmem:[#allocation2 + $0x308] sm:$0xff]  ;;  %vm541_vm0 = vcmask 130112   ;;  %vm548_vm1 = vcmask 195712  }
  0x1e   :  { %v75_v2 = vld [vmem:[#allocation2 + $0x100] sm:$0xff]  ;;  %v315_v3 = vadd.f32 %v140_v1, %v139_v0  ;;  %v76_v4 = vld [vmem:[#allocation2 + $0x108] sm:$0xff]  ;;  %v141_v5 = vld [vmem:[#allocation2 + $0x310] sm:$0xff]  ;;  %vm555_vm2 = vcmask 261312   ;;  %vm562_vm3 = vcmask 326912   ;;  %vm569_vm4 = vcmask 392512  }
  0x1f   :  { %v142_v6 = vld [vmem:[#allocation2 + $0x318] sm:$0xff]  ;;  %v219_v7 = vadd.f32 %v76_v4, %v75_v2  ;;  %v77_v8 = vld [vmem:[#allocation2 + $0x110] sm:$0xff]  ;;  %v43_v14 = vld [vmem:[#allocation2] sm:$0xff]  ;;  %vm576_vm5 = vcmask 458112   ;;  %vm583_vm6 = vcmask 523712   ;;  %vm590_vm7 = vcmask 589312  }
  0x20   :  { %v78_v9 = vld [vmem:[#allocation2 + $0x118] sm:$0xff]  ;;  %316 = vadd.xlane.f32.xlu1 %v315_v3  ;;  %v318_v10 = vadd.f32 %v142_v6, %v141_v5  ;;  %v45_v12 = vld [vmem:[#allocation2 + $0x10] sm:$0xff]  ;;  %v44_v15 = vld [vmem:[#allocation2 + $0x8] sm:$0xff]  ;;  %vm597_vm8 = vcmask 654912   ;;  %vm604_vm9 = vcmask 720512   ;;  %vm611_vm10 = vcmask 786112  }
  0x21   :  { %220 = vadd.xlane.f32.xlu0 %v219_v7  ;;  %v222_v11 = vadd.f32 %v78_v9, %v77_v8  ;;  %v46_v13 = vld [vmem:[#allocation2 + $0x18] sm:$0xff]  ;;  %v171_v17 = vadd.f32 %v44_v15, %v43_v14  ;;  %v107_v18 = vld [vmem:[#allocation2 + $0x200] sm:$0xff]  ;;  %v108_v19 = vld [vmem:[#allocation2 + $0x208] sm:$0xff]  ;;  %vm618_vm11 = vcmask 851712   ;;  %vm625_vm12 = vcmask 917312   ;;  %s1085_s26 = smov [#allocation7]  }
  0x22   :  { %v174_v16 = vadd.f32 %v46_v13, %v45_v12  ;;  %v79_v20 = vld [vmem:[#allocation2 + $0x120] sm:$0xff]  ;;  %v80_v21 = vld [vmem:[#allocation2 + $0x128] sm:$0xff]  ;;  %v267_v22 = vadd.f32 %v108_v19, %v107_v18  ;;  %v109_v26 = vld [vmem:[#allocation2 + $0x210] sm:$0xff]  ;;  %vm632_vm13 = vcmask 982912   ;;  %vm639_vm14 = vcmask 1048512   ;;  %s960_s27 = sshll.u32 %s1085_s26, 4  ;;  %s961_s27 = int_to_ptr.vmem [resolvable:$true] %s960_s27 }
  0x23   :  { %v225_v23 = vadd.f32 %v80_v21, %v79_v20  ;;  %v143_v24 = vld [vmem:[#allocation2 + $0x320] sm:$0xff]  ;;  %v144_v25 = vld [vmem:[#allocation2 + $0x328] sm:$0xff]  ;;  %v110_v27 = vld [vmem:[#allocation2 + $0x218] sm:$0xff]  ;;  %vm878_vm15 = vcmask 1041409   ;;  %s1053_s28 = scalar_lea.vmem %s961_s27, 32  ;;  %p1058_p11 = scmp.lt.s32.totalorder %s961_s27, %s961_s27 }
  0x24   :  { %319 = vadd.xlane.f32.xlu1 %v318_v10  ;;  %v321_v28 = vadd.f32 %v144_v25, %v143_v24  ;;  %v270_v29 = vadd.f32 %v110_v27, %v109_v26  ;;  %v81_v30 = vld [vmem:[#allocation2 + $0x130] sm:$0xff]  ;;  %v82_v31 = vld [vmem:[#allocation2 + $0x138] sm:$0xff]  ;;  %v47_v32 = vld [vmem:[#allocation2 + $0x20] sm:$0xff]  ;;  %p1054_p10 = scmp.ne.s32.totalorder %s961_s27, %s1053_s28  ;;  %p1059_p12 = scmp.lt.s32.totalorder %s1053_s28, %s1053_s28 }
  0x25   :  { %223 = vadd.xlane.f32.xlu0 %v222_v11  ;;  %v48_v33 = vld [vmem:[#allocation2 + $0x28] sm:$0xff]  ;;  %v228_v34 = vadd.f32 %v82_v31, %v81_v30  ;;  %v145_v36 = vld [vmem:[#allocation2 + $0x330] sm:$0xff]  ;;  %v146_v37 = vld [vmem:[#allocation2 + $0x338] sm:$0xff] }
  0x26   :  { %v177_v35 = vadd.f32 %v48_v33, %v47_v32  ;;  %v111_v38 = vld [vmem:[#allocation2 + $0x220] sm:$0xff]  ;;  %v112_v39 = vld [vmem:[#allocation2 + $0x228] sm:$0xff]  ;;  %v324_v40 = vadd.f32 %v146_v37, %v145_v36  ;;  %v49_v44 = vld [vmem:[#allocation2 + $0x30] sm:$0xff]  ;;  %p1060_p13 = por %p1059_p12, %p1058_p11 }
  0x27   :  { %v273_v41 = vadd.f32 %v112_v39, %v111_v38  ;;  %v83_v42 = vld [vmem:[#allocation2 + $0x140] sm:$0xff]  ;;  %v84_v43 = vld [vmem:[#allocation2 + $0x148] sm:$0xff]  ;;  %v50_v45 = vld [vmem:[#allocation2 + $0x38] sm:$0xff] }
  0x28   :  { %175 = vadd.xlane.f32.xlu1 %v174_v16  ;;  %v231_v46 = vadd.f32 %v84_v43, %v83_v42  ;;  %v180_v47 = vadd.f32 %v50_v45, %v49_v44  ;;  %v147_v48 = vld [vmem:[#allocation2 + $0x340] sm:$0xff]  ;;  %v148_v49 = vld [vmem:[#allocation2 + $0x348] sm:$0xff]  ;;  %v113_v50 = vld [vmem:[#allocation2 + $0x230] sm:$0xff]  ;;  %p1061_p0 = pnand %p1060_p13, %p1054_p10 }
  0x29   :  { %172 = vadd.xlane.f32.xlu0 %v171_v17  ;;  %v114_v51 = vld [vmem:[#allocation2 + $0x238] sm:$0xff]  ;;  %v327_v52 = vadd.f32 %v148_v49, %v147_v48  ;;  %v85_v54 = vld [vmem:[#allocation2 + $0x150] sm:$0xff]  ;;  %v51_v56 = vld [vmem:[#allocation2 + $0x40] sm:$0xff] }
  0x2a   :  { %v276_v53 = vadd.f32 %v114_v51, %v113_v50  ;;  %v86_v55 = vld [vmem:[#allocation2 + $0x158] sm:$0xff]  ;;  %v52_v57 = vld [vmem:[#allocation2 + $0x48] sm:$0xff]  ;;  %v149_v60 = vld [vmem:[#allocation2 + $0x350] sm:$0xff] }
  0x2b   :  { %v234_v58 = vadd.f32 %v86_v55, %v85_v54  ;;  %v183_v59 = vadd.f32 %v52_v57, %v51_v56  ;;  %v150_v61 = vld [vmem:[#allocation2 + $0x358] sm:$0xff]  ;;  %v115_v62 = vld [vmem:[#allocation2 + $0x240] sm:$0xff]  ;;  %v116_v63 = vld [vmem:[#allocation2 + $0x248] sm:$0xff] }
  0x2c   :  { %268 = vadd.xlane.f32.xlu1 %v267_v22  ;;  %v330_v0 = vadd.f32 %v150_v61, %v149_v60  ;;  %v279_v1 = vadd.f32 %v116_v63, %v115_v62  ;;  %v87_v2 = vld [vmem:[#allocation2 + $0x160] sm:$0xff]  ;;  %v88_v3 = vld [vmem:[#allocation2 + $0x168] sm:$0xff]  ;;  %v53_v4 = vld [vmem:[#allocation2 + $0x50] sm:$0xff] }
  0x2d   :  { %226 = vadd.xlane.f32.xlu0 %v225_v23  ;;  %v54_v5 = vld [vmem:[#allocation2 + $0x58] sm:$0xff]  ;;  %v237_v6 = vadd.f32 %v88_v3, %v87_v2  ;;  %v151_v8 = vld [vmem:[#allocation2 + $0x360] sm:$0xff]  ;;  %v152_v9 = vld [vmem:[#allocation2 + $0x368] sm:$0xff] }
  0x2e   :  { %v186_v7 = vadd.f32 %v54_v5, %v53_v4  ;;  %v117_v10 = vld [vmem:[#allocation2 + $0x250] sm:$0xff]  ;;  %v118_v11 = vld [vmem:[#allocation2 + $0x258] sm:$0xff]  ;;  %v333_v12 = vadd.f32 %v152_v9, %v151_v8  ;;  %v55_v16 = vld [vmem:[#allocation2 + $0x60] sm:$0xff] }
  0x2f   :  { %v282_v13 = vadd.f32 %v118_v11, %v117_v10  ;;  %v89_v14 = vld [vmem:[#allocation2 + $0x170] sm:$0xff]  ;;  %v90_v15 = vld [vmem:[#allocation2 + $0x178] sm:$0xff]  ;;  %v56_v17 = vld [vmem:[#allocation2 + $0x68] sm:$0xff] }
  0x30   :  { %322 = vadd.xlane.f32.xlu1 %v321_v28  ;;  %v240_v18 = vadd.f32 %v90_v15, %v89_v14  ;;  %v189_v19 = vadd.f32 %v56_v17, %v55_v16  ;;  %v153_v20 = vld [vmem:[#allocation2 + $0x370] sm:$0xff]  ;;  %v154_v21 = vld [vmem:[#allocation2 + $0x378] sm:$0xff]  ;;  %v119_v22 = vld [vmem:[#allocation2 + $0x260] sm:$0xff] }
  0x31   :  { %271 = vadd.xlane.f32.xlu0 %v270_v29  ;;  %v120_v23 = vld [vmem:[#allocation2 + $0x268] sm:$0xff]  ;;  %v336_v24 = vadd.f32 %v154_v21, %v153_v20  ;;  %v91_v26 = vld [vmem:[#allocation2 + $0x180] sm:$0xff]  ;;  %v57_v28 = vld [vmem:[#allocation2 + $0x70] sm:$0xff] }
  0x32   :  { %v285_v25 = vadd.f32 %v120_v23, %v119_v22  ;;  %v92_v27 = vld [vmem:[#allocation2 + $0x188] sm:$0xff]  ;;  %v58_v29 = vld [vmem:[#allocation2 + $0x78] sm:$0xff]  ;;  %v155_v32 = vld [vmem:[#allocation2 + $0x380] sm:$0xff] }
  0x33   :  { %v243_v30 = vadd.f32 %v92_v27, %v91_v26  ;;  %v192_v31 = vadd.f32 %v58_v29, %v57_v28  ;;  %v156_v33 = vld [vmem:[#allocation2 + $0x388] sm:$0xff]  ;;  %v93_v38 = vld [vmem:[#allocation2 + $0x190] sm:$0xff]  ;;  %v94_v39 = vld [vmem:[#allocation2 + $0x198] sm:$0xff] }
  0x34   :  { %229 = vadd.xlane.f32.xlu1 %v228_v34  ;;  %v121_v34 = vld [vmem:[#allocation2 + $0x270] sm:$0xff]  ;;  %v339_v36 = vadd.f32 %v156_v33, %v155_v32  ;;  %v246_v42 = vadd.f32 %v94_v39, %v93_v38  ;;  %v158_v45 = vld [vmem:[#allocation2 + $0x398] sm:$0xff]  ;;  %v95_v50 = vld [vmem:[#allocation2 + $0x1a0] sm:$0xff] }
  0x35   :  { %178 = vadd.xlane.f32.xlu0 %v177_v35  ;;  %v122_v35 = vld [vmem:[#allocation2 + $0x278] sm:$0xff]  ;;  %v157_v44 = vld [vmem:[#allocation2 + $0x390] sm:$0xff]  ;;  %v96_v51 = vld [vmem:[#allocation2 + $0x1a8] sm:$0xff] }
  0x36   :  { %v288_v37 = vadd.f32 %v122_v35, %v121_v34  ;;  %v342_v48 = vadd.f32 %v158_v45, %v157_v44  ;;  %v249_v54 = vadd.f32 %v96_v51, %v95_v50  ;;  %v159_v56 = vld [vmem:[#allocation2 + $0x3a0] sm:$0xff]  ;;  %v160_v57 = vld [vmem:[#allocation2 + $0x3a8] sm:$0xff]  ;;  %v97_v62 = vld [vmem:[#allocation2 + $0x1b0] sm:$0xff] }
  0x37   :  { %v345_v60 = vadd.f32 %v160_v57, %v159_v56  ;;  %v98_v63 = vld [vmem:[#allocation2 + $0x1b8] sm:$0xff]  ;;  %v161_v4 = vld [vmem:[#allocation2 + $0x3b0] sm:$0xff]  ;;  %v99_v10 = vld [vmem:[#allocation2 + $0x1c0] sm:$0xff] }
  0x38   :  { %325 = vadd.xlane.f32.xlu1 %v324_v40  ;;  %v59_v40 = vld [vmem:[#allocation2 + $0x80] sm:$0xff]  ;;  %v252_v2 = vadd.f32 %v98_v63, %v97_v62  ;;  %v162_v5 = vld [vmem:[#allocation2 + $0x3b8] sm:$0xff]  ;;  %v100_v11 = vld [vmem:[#allocation2 + $0x1c8] sm:$0xff] }
  0x39   :  { %274 = vadd.xlane.f32.xlu0 %v273_v41  ;;  %v60_v41 = vld [vmem:[#allocation2 + $0x88] sm:$0xff]  ;;  %v348_v8 = vadd.f32 %v162_v5, %v161_v4  ;;  %v255_v14 = vadd.f32 %v100_v11, %v99_v10  ;;  %v163_v16 = vld [vmem:[#allocation2 + $0x3c0] sm:$0xff]  ;;  %v101_v22 = vld [vmem:[#allocation2 + $0x1d0] sm:$0xff] }
  0x3a   :  { %v195_v43 = vadd.f32 %v60_v41, %v59_v40  ;;  %v164_v17 = vld [vmem:[#allocation2 + $0x3c8] sm:$0xff]  ;;  %v102_v23 = vld [vmem:[#allocation2 + $0x1d8] sm:$0xff]  ;;  %v165_v28 = vld [vmem:[#allocation2 + $0x3d0] sm:$0xff] }
  0x3b   :  { %v351_v20 = vadd.f32 %v164_v17, %v163_v16  ;;  %v258_v26 = vadd.f32 %v102_v23, %v101_v22  ;;  %v166_v29 = vld [vmem:[#allocation2 + $0x3d8] sm:$0xff]  ;;  %v103_v34 = vld [vmem:[#allocation2 + $0x1e0] sm:$0xff]  ;;  %v104_v35 = vld [vmem:[#allocation2 + $0x1e8] sm:$0xff]  ;;  %v530_v22 = vlaneseq }
  0x3c   :  { %232 = vadd.xlane.f32.xlu1 %v231_v46  ;;  %v123_v46 = vld [vmem:[#allocation2 + $0x280] sm:$0xff]  ;;  %v354_v32 = vadd.f32 %v166_v29, %v165_v28  ;;  %v261_v38 = vadd.f32 %v104_v35, %v103_v34  ;;  %v168_v41 = vld [vmem:[#allocation2 + $0x3e8] sm:$0xff]  ;;  %v458_v45 = vld [vmem:[#allocation5 + $0xf8] sm:$0xff] }
  0x3d   :  { %181 = vadd.xlane.f32.xlu0 %v180_v47  ;;  %v124_v47 = vld [vmem:[#allocation2 + $0x288] sm:$0xff]  ;;  %v167_v40 = vld [vmem:[#allocation2 + $0x3e0] sm:$0xff]  ;;  %971 = vmatprep.subr.mxu0 %v458_v45  ;;  %v169_v57 = vld [vmem:[#allocation2 + $0x3f0] sm:$0xff] }
  0x3e   :  { %v291_v49 = vadd.f32 %v124_v47, %v123_v46  ;;  %v357_v44 = vadd.f32 %v168_v41, %v167_v40  ;;  %v105_v47 = vld [vmem:[#allocation2 + $0x1f0] sm:$0xff]  ;;  %v71_v50 = vld [vmem:[#allocation2 + $0xe0] sm:$0xff]  ;;  %v72_v51 = vld [vmem:[#allocation2 + $0xe8] sm:$0xff] }
  0x3f   :  { %v213_v56 = vadd.f32 %v72_v51, %v71_v50  ;;  %v455_v62 = vld [vmem:[#allocation5 + $0xe0] sm:$0xff]  ;;  %v138_v4 = vld [vmem:[#allocation2 + $0x2f8] sm:$0xff]  ;;  %v452_v11 = vld [vmem:[#allocation5 + $0xc8] sm:$0xff] }
  0x40   :  { %328 = vadd.xlane.f32.xlu1 %v327_v52  ;;  %v61_v52 = vld [vmem:[#allocation2 + $0x90] sm:$0xff]  ;;  %v439_v63 = vld [vmem:[#allocation5 + $0x60] sm:$0xff]  ;;  %v438_v5 = vld [vmem:[#allocation5 + $0x58] sm:$0xff] }
  0x41   :  { %277 = vadd.xlane.f32.xlu0 %v276_v53  ;;  %v62_v53 = vld [vmem:[#allocation2 + $0x98] sm:$0xff]  ;;  %v447_v23 = vld [vmem:[#allocation5 + $0xa0] sm:$0xff]  ;;  %v445_v28 = vld [vmem:[#allocation5 + $0x90] sm:$0xff] }
  0x42   :  { %v198_v55 = vadd.f32 %v62_v53, %v61_v52  ;;  %v457_v52 = vld [vmem:[#allocation5 + $0xf0] sm:$0xff]  ;;  %v450_v16 = vld [vmem:[#allocation5 + $0xb8] sm:$0xff]  ;;  %v428_v34 = vld [vmem:[#allocation5 + $0x8] sm:$0xff] }
  0x43   :  { %v441_v53 = vld [vmem:[#allocation5 + $0x70] sm:$0xff]  ;;  %v434_v17 = vld [vmem:[#allocation5 + $0x38] sm:$0xff]  ;;  %v443_v35 = vld [vmem:[#allocation5 + $0x80] sm:$0xff] }
  0x44   :  { %235 = vadd.xlane.f32.xlu1 %v234_v58  ;;  %v125_v58 = vld [vmem:[#allocation2 + $0x290] sm:$0xff] }
  0x45   :  { %184 = vadd.xlane.f32.xlu0 %v183_v59  ;;  %v126_v59 = vld [vmem:[#allocation2 + $0x298] sm:$0xff]  ;;  %v429_v29 = vld [vmem:[#allocation5 + $0x10] sm:$0xff] }
  0x46   :  { %v294_v61 = vadd.f32 %v126_v59, %v125_v58  ;;  %v170_v58 = vld [vmem:[#allocation2 + $0x3f8] sm:$0xff]  ;;  %v440_v59 = vld [vmem:[#allocation5 + $0x68] sm:$0xff] }
  0x48   :  { %331 = vadd.xlane.f32.xlu1 %v330_v0  ;;  %v63_v0 = vld [vmem:[#allocation2 + $0xa0] sm:$0xff] }
  0x49   :  { %280 = vadd.xlane.f32.xlu0 %v279_v1  ;;  %v64_v1 = vld [vmem:[#allocation2 + $0xa8] sm:$0xff] }
  0x4a   :  { %v201_v3 = vadd.f32 %v64_v1, %v63_v0  ;;  %v360_v0 = vadd.f32 %v170_v58, %v169_v57  ;;  %v454_v1 = vld [vmem:[#allocation5 + $0xd8] sm:$0xff] }
  0x4c   :  { %238 = vadd.xlane.f32.xlu1 %v237_v6  ;;  %v127_v6 = vld [vmem:[#allocation2 + $0x2a0] sm:$0xff] }
  0x4d   :  { %187 = vadd.xlane.f32.xlu0 %v186_v7  ;;  %v128_v7 = vld [vmem:[#allocation2 + $0x2a8] sm:$0xff] }
  0x4e   :  { %v297_v9 = vadd.f32 %v128_v7, %v127_v6  ;;  %v73_v6 = vld [vmem:[#allocation2 + $0xf0] sm:$0xff]  ;;  %v74_v7 = vld [vmem:[#allocation2 + $0xf8] sm:$0xff] }
  0x50   :  { %334 = vadd.xlane.f32.xlu1 %v333_v12  ;;  %v65_v12 = vld [vmem:[#allocation2 + $0xb0] sm:$0xff] }
  0x51   :  { %283 = vadd.xlane.f32.xlu0 %v282_v13  ;;  %v66_v13 = vld [vmem:[#allocation2 + $0xb8] sm:$0xff] }
  0x52   :  { %v204_v15 = vadd.f32 %v66_v13, %v65_v12  ;;  %v216_v12 = vadd.f32 %v74_v7, %v73_v6  ;;  %v436_v13 = vld [vmem:[#allocation5 + $0x48] sm:$0xff] }
  0x54   :  { %241 = vadd.xlane.f32.xlu1 %v240_v18  ;;  %v129_v18 = vld [vmem:[#allocation2 + $0x2b0] sm:$0xff] }
  0x55   :  { %190 = vadd.xlane.f32.xlu0 %v189_v19  ;;  %v130_v19 = vld [vmem:[#allocation2 + $0x2b8] sm:$0xff] }
  0x56   :  { %v300_v21 = vadd.f32 %v130_v19, %v129_v18  ;;  %v449_v18 = vld [vmem:[#allocation5 + $0xb0] sm:$0xff] }
  0x57   :  { %v433_v19 = vld [vmem:[#allocation5 + $0x30] sm:$0xff] }
  0x58   :  { %337 = vadd.xlane.f32.xlu1 %v336_v24  ;;  %v67_v24 = vld [vmem:[#allocation2 + $0xc0] sm:$0xff] }
  0x59   :  { %286 = vadd.xlane.f32.xlu0 %v285_v25  ;;  %v68_v25 = vld [vmem:[#allocation2 + $0xc8] sm:$0xff] }
  0x5a   :  { %v207_v27 = vadd.f32 %v68_v25, %v67_v24  ;;  %v431_v24 = vld [vmem:[#allocation5 + $0x20] sm:$0xff]  ;;  %v446_v25 = vld [vmem:[#allocation5 + $0x98] sm:$0xff] }
  0x5c   :  { %244 = vadd.xlane.f32.xlu1 %v243_v30  ;;  %v131_v30 = vld [vmem:[#allocation2 + $0x2c0] sm:$0xff] }
  0x5d   :  { %193 = vadd.xlane.f32.xlu0 %v192_v31  ;;  %v132_v31 = vld [vmem:[#allocation2 + $0x2c8] sm:$0xff] }
  0x5e   :  { %v303_v33 = vadd.f32 %v132_v31, %v131_v30  ;;  %v1114_v30 = vshrl.u32 %v530_v22, 7 }
  0x60   :  { %340 = vadd.xlane.f32.xlu1 %v339_v36  ;;  %v69_v36 = vld [vmem:[#allocation2 + $0xd0] sm:$0xff] }
  0x61   :  { %289 = vadd.xlane.f32.xlu0 %v288_v37  ;;  %v70_v37 = vld [vmem:[#allocation2 + $0xd8] sm:$0xff] }
  0x62   :  { %v210_v39 = vadd.f32 %v70_v37, %v69_v36  ;;  %v427_v36 = vld [vmem:[#allocation5] sm:$0xff] }
  0x64   :  { %247 = vadd.xlane.f32.xlu1 %v246_v42  ;;  %v133_v42 = vld [vmem:[#allocation2 + $0x2d0] sm:$0xff] }
  0x65   :  { %196 = vadd.xlane.f32.xlu0 %v195_v43  ;;  %v134_v43 = vld [vmem:[#allocation2 + $0x2d8] sm:$0xff] }
  0x66   :  { %v306_v46 = vadd.f32 %v134_v43, %v133_v42 }
  0x68   :  { %343 = vadd.xlane.f32.xlu1 %v342_v48  ;;  %v106_v48 = vld [vmem:[#allocation2 + $0x1f8] sm:$0xff] }
  0x69   :  { %292 = vadd.xlane.f32.xlu0 %v291_v49  ;;  %v442_v49 = vld [vmem:[#allocation5 + $0x78] sm:$0xff] }
  0x6a   :  { %972 = vmatpush3.msra.mxu0 %v442_v49 }
  0x6b   :  { %973 = vmatprep.subr.mxu0 %v457_v52 }
  0x6c   :  { %250 = vadd.xlane.f32.xlu1 %v249_v54  ;;  %v264_v54 = vadd.f32 %v106_v48, %v105_v47  ;;  %974 = vmatpush3.msra.mxu0 %v441_v53 }
  0x6d   :  { %199 = vadd.xlane.f32.xlu0 %v198_v55  ;;  %v456_v55 = vld [vmem:[#allocation5 + $0xe8] sm:$0xff] }
  0x6e   :  { %975 = vmatprep.subr.mxu0 %v456_v55 }
  0x6f   :  { %976 = vmatpush3.msra.mxu0 %v440_v59 }
  0x70   :  { %346 = vadd.xlane.f32.xlu1 %v345_v60  ;;  %v135_v60 = vld [vmem:[#allocation2 + $0x2e0] sm:$0xff]  ;;  %977 = vmatprep.subr.mxu0 %v455_v62 }
  0x71   :  { %295 = vadd.xlane.f32.xlu0 %v294_v61  ;;  %v136_v61 = vld [vmem:[#allocation2 + $0x2e8] sm:$0xff]  ;;  %978 = vmatpush3.msra.mxu0 %v439_v63 }
  0x72   :  { %979 = vmatprep.subr.mxu0 %v454_v1 }
  0x73   :  { %980 = vmatpush3.msra.mxu0 %v438_v5 }
  0x74   :  { %253 = vadd.xlane.f32.xlu1 %v252_v2  ;;  %v309_v2 = vadd.f32 %v136_v61, %v135_v60 }
  0x75   :  { %202 = vadd.xlane.f32.xlu0 %v201_v3  ;;  %v137_v3 = vld [vmem:[#allocation2 + $0x2f0] sm:$0xff] }
  0x76   :  { %v312_v10 = vadd.f32 %v138_v4, %v137_v3 }
  0x78   :  { %349 = vadd.xlane.f32.xlu1 %v348_v8  ;;  %v453_v8 = vld [vmem:[#allocation5 + $0xd0] sm:$0xff] }
  0x79   :  { %298 = vadd.xlane.f32.xlu0 %v297_v9  ;;  %981 = vmatprep.subr.mxu0 %v453_v8  ;;  %v437_v9 = vld [vmem:[#allocation5 + $0x50] sm:$0xff] }
  0x7a   :  { %982 = vmatpush3.msra.mxu0 %v437_v9 }
  0x7b   :  { %983 = vmatprep.subr.mxu0 %v452_v11 }
  0x7c   :  { %256 = vadd.xlane.f32.xlu1 %v255_v14  ;;  %984 = vmatpush3.msra.mxu0 %v436_v13  ;;  %v451_v14 = vld [vmem:[#allocation5 + $0xc0] sm:$0xff] }
  0x7d   :  { %205 = vadd.xlane.f32.xlu0 %v204_v15  ;;  %985 = vmatprep.subr.mxu0 %v451_v14  ;;  %v435_v15 = vld [vmem:[#allocation5 + $0x40] sm:$0xff] }
  0x7e   :  { %986 = vmatpush3.msra.mxu0 %v435_v15 }
  0x7f   :  { %987 = vmatprep.subr.mxu0 %v450_v16 }
  0x80   :  { %352 = vadd.xlane.f32.xlu1 %v351_v20  ;;  %988 = vmatpush3.msra.mxu0 %v434_v17  ;;  %v448_v20 = vld [vmem:[#allocation5 + $0xa8] sm:$0xff] }
  0x81   :  { %301 = vadd.xlane.f32.xlu0 %v300_v21  ;;  %989 = vmatprep.subr.mxu0 %v449_v18  ;;  %v432_v21 = vld [vmem:[#allocation5 + $0x28] sm:$0xff] }
  0x82   :  { %990 = vmatpush3.msra.mxu0 %v433_v19 }
  0x83   :  { %991 = vmatprep.subr.mxu0 %v448_v20 }
  0x84   :  { %259 = vadd.xlane.f32.xlu1 %v258_v26  ;;  %992 = vmatpush3.msra.mxu0 %v432_v21  ;;  %v430_v26 = vld [vmem:[#allocation5 + $0x18] sm:$0xff] }
  0x85   :  { %208 = vadd.xlane.f32.xlu0 %v207_v27  ;;  %993 = vmatprep.subr.mxu0 %v447_v23  ;;  %v1112_v27 = vand.u32 127, %v530_v22 }
  0x86   :  { %994 = vmatpush3.msra.mxu0 %v431_v24 }
  0x87   :  { %995 = vmatprep.subr.mxu0 %v446_v25  ;;  %v536_v31 = vadd.s32 4294967288, %v1112_v27  ;;  %v543_v51 = vadd.s32 4294967280, %v1112_v27  ;;  %v557_v19 = vadd.s32 4294967264, %v1112_v27 }
  0x88   :  { %355 = vadd.xlane.f32.xlu1 %v354_v32  ;;  %996 = vmatpush3.msra.mxu0 %v430_v26  ;;  %v444_v32 = vld [vmem:[#allocation5 + $0x88] sm:$0xff] }
  0x89   :  { %304 = vadd.xlane.f32.xlu0 %v303_v33  ;;  %997 = vmatprep.subr.mxu0 %v445_v28  ;;  %v539_v40 = vsub.s32 %v536_v31, %v1114_v30  ;;  %v546_v60 = vsub.s32 %v543_v51, %v1114_v30 }
  0x8a   :  { %998 = vmatpush3.msra.mxu0 %v429_v29  ;;  %v560_v29 = vsub.s32 %v557_v19, %v1114_v30 }
  0x8b   :  { %999 = vmatprep.subr.mxu0 %v444_v32 }
  0x8c   :  { %262 = vadd.xlane.f32.xlu1 %v261_v38  ;;  %1000 = vmatpush3.msra.mxu0 %v428_v34  ;;  %v534_v38 = vsub.s32 %v1112_v27, %v1114_v30 }
  0x8d   :  { %211 = vadd.xlane.f32.xlu0 %v210_v39  ;;  %1001 = vmatprep.subr.mxu0 %v443_v35 }
  0x8e   :  { %1002 = vmatpush3.msra.mxu0 %v427_v36 }
  0x90   :  { %358 = vadd.xlane.f32.xlu1 %v357_v44 }
  0x91   :  { %307 = vadd.xlane.f32.xlu0 %v306_v46 }
  0x94   :  { %265 = vadd.xlane.f32.xlu1 %v264_v54 }
  0x95   :  { %214 = vadd.xlane.f32.xlu0 %v213_v56 }
  0x98   :  { %361 = vadd.xlane.f32.xlu1 %v360_v0  ;;  %v550_v0 = vadd.s32 4294967272, %v1112_v27 }
  0x99   :  { %310 = vadd.xlane.f32.xlu0 %v309_v2 }
  0x9a   :  { %v553_v9 = vsub.s32 %v550_v0, %v1114_v30 }
  0x9c   :  { %313 = vadd.xlane.f32.xlu1 %v312_v10 }
  0x9d   :  { %217 = vadd.xlane.f32.xlu0 %v216_v12 }
  0xa9   :  { %v317_v33 = vpop.xlane.xlu1 %316 }
  0xaa   :  { %v221_v37 = vpop.xlane.xlu0 %220  ;;  %v411_v39 = vmul.f32 0.00390625, %v317_v33 }
  0xab   :  { %v379_v41 = vmul.f32 0.00390625, %v221_v37 }
  0xac   :  { %v802_v46 = vrot.slane %v411_v39, %v534_v38  ;;  %v564_v39 = vadd.s32 4294967256, %v1112_v27 }
  0xad   :  { %v320_v42 = vpop.xlane.xlu1 %319  ;;  %v644_v48 = vrot.slane %v379_v41, %v534_v38 }
  0xae   :  { %v412_v43 = vmul.f32 0.00390625, %v320_v42  ;;  %v224_v44 = vpop.xlane.xlu0 %223 }
  0xaf   :  { %v380_v45 = vmul.f32 0.00390625, %v224_v44 }
  0xb0   :  { %v806_v47 = vrot.slane %v412_v43, %v539_v40 }
  0xb1   :  { %v648_v49 = vrot.slane %v380_v45, %v539_v40  ;;  %v176_v50 = vpop.xlane.xlu1 %175 }
  0xb2   :  { %v807_v52 = vsel %vm541_vm0, %v806_v47, %v802_v46  ;;  %v364_v53 = vmul.f32 0.00390625, %v176_v50  ;;  %v173_v54 = vpop.xlane.xlu0 %172 }
  0xb3   :  { %v649_v55 = vsel %vm541_vm0, %v648_v49, %v644_v48  ;;  %v363_v56 = vmul.f32 0.00390625, %v173_v54  ;;  %v567_v48 = vsub.s32 %v564_v39, %v1114_v30 }
  0xb4   :  { %v540_v57 = vrot.slane %v364_v53, %v539_v40 }
  0xb5   :  { %v535_v58 = vrot.slane %v363_v56, %v534_v38  ;;  %v269_v59 = vpop.xlane.xlu1 %268 }
  0xb6   :  { %v227_v61 = vpop.xlane.xlu0 %226  ;;  %v395_v1 = vmul.f32 0.00390625, %v269_v59 }
  0xb7   :  { %v542_v62 = vsel %vm541_vm0, %v540_v57, %v535_v58  ;;  %v381_v63 = vmul.f32 0.00390625, %v227_v61  ;;  %v571_v57 = vadd.s32 4294967248, %v1112_v27 }
  0xb8   :  { %v723_v10 = vrot.slane %v395_v1, %v534_v38 }
  0xb9   :  { %v653_v2 = vrot.slane %v381_v63, %v546_v60  ;;  %v323_v3 = vpop.xlane.xlu1 %322 }
  0xba   :  { %v413_v4 = vmul.f32 0.00390625, %v323_v3  ;;  %v272_v5 = vpop.xlane.xlu0 %271 }
  0xbb   :  { %v654_v6 = vsel %vm548_vm1, %v653_v2, %v649_v55  ;;  %v396_v7 = vmul.f32 0.00390625, %v272_v5  ;;  %v1146_v2 = vsub.s32 %v571_v57, %v1114_v30 }
  0xbc   :  { %v811_v8 = vrot.slane %v413_v4, %v546_v60 }
  0xbd   :  { %v727_v11 = vrot.slane %v396_v7, %v539_v40  ;;  %v230_v12 = vpop.xlane.xlu1 %229 }
  0xbe   :  { %v812_v13 = vsel %vm548_vm1, %v811_v8, %v807_v52  ;;  %v382_v14 = vmul.f32 0.00390625, %v230_v12  ;;  %v179_v15 = vpop.xlane.xlu0 %178 }
  0xbf   :  { %v728_v16 = vsel %vm541_vm0, %v727_v11, %v723_v10  ;;  %v365_v17 = vmul.f32 0.00390625, %v179_v15 }
  0xc0   :  { %v658_v18 = vrot.slane %v382_v14, %v553_v9 }
  0xc1   :  { %v547_v20 = vrot.slane %v365_v17, %v546_v60  ;;  %v326_v21 = vpop.xlane.xlu1 %325 }
  0xc2   :  { %v659_v22 = vsel %vm555_vm2, %v658_v18, %v654_v6  ;;  %v414_v23 = vmul.f32 0.00390625, %v326_v21  ;;  %v275_v24 = vpop.xlane.xlu0 %274 }
  0xc3   :  { %v549_v25 = vsel %vm548_vm1, %v547_v20, %v542_v62  ;;  %v397_v26 = vmul.f32 0.00390625, %v275_v24 }
  0xc4   :  { %v816_v28 = vrot.slane %v414_v23, %v553_v9 }
  0xc5   :  { %v732_v31 = vrot.slane %v397_v26, %v546_v60  ;;  %v233_v32 = vpop.xlane.xlu1 %232 }
  0xc6   :  { %v817_v33 = vsel %vm555_vm2, %v816_v28, %v812_v13  ;;  %v383_v34 = vmul.f32 0.00390625, %v233_v32  ;;  %v182_v35 = vpop.xlane.xlu0 %181 }
  0xc7   :  { %v733_v36 = vsel %vm548_vm1, %v732_v31, %v728_v16  ;;  %v366_v37 = vmul.f32 0.00390625, %v182_v35 }
  0xc8   :  { %v663_v38 = vrot.slane %v383_v34, %v560_v29 }
  0xc9   :  { %v554_v40 = vrot.slane %v366_v37, %v553_v9  ;;  %v329_v41 = vpop.xlane.xlu1 %328 }
  0xca   :  { %v664_v42 = vsel %vm562_vm3, %v663_v38, %v659_v22  ;;  %v415_v43 = vmul.f32 0.00390625, %v329_v41  ;;  %v278_v44 = vpop.xlane.xlu0 %277  ;;  %v578_v41 = vadd.s32 4294967240, %v1112_v27 }
  0xcb   :  { %v556_v45 = vsel %vm555_vm2, %v554_v40, %v549_v25  ;;  %v398_v46 = vmul.f32 0.00390625, %v278_v44  ;;  %v585_v44 = vadd.s32 4294967232, %v1112_v27 }
  0xcc   :  { %v821_v47 = vrot.slane %v415_v43, %v560_v29 }
  0xcd   :  { %v737_v49 = vrot.slane %v398_v46, %v553_v9  ;;  %v236_v50 = vpop.xlane.xlu1 %235  ;;  %v592_v46 = vadd.s32 4294967224, %v1112_v27 }
  0xce   :  { %v822_v51 = vsel %vm562_vm3, %v821_v47, %v817_v33  ;;  %v384_v52 = vmul.f32 0.00390625, %v236_v50  ;;  %v185_v53 = vpop.xlane.xlu0 %184  ;;  %v599_v47 = vadd.s32 4294967216, %v1112_v27  ;;  %v606_v50 = vadd.s32 4294967208, %v1112_v27 }
  0xcf   :  { %v738_v54 = vsel %vm555_vm2, %v737_v49, %v733_v36  ;;  %v367_v55 = vmul.f32 0.00390625, %v185_v53 }
  0xd0   :  { %v668_v56 = vrot.slane %v384_v52, %v567_v48 }
  0xd1   :  { %v561_v58 = vrot.slane %v367_v55, %v560_v29  ;;  %v332_v59 = vpop.xlane.xlu1 %331 }
  0xd2   :  { %v669_v60 = vsel %vm569_vm4, %v668_v56, %v664_v42  ;;  %v416_v61 = vmul.f32 0.00390625, %v332_v59  ;;  %v281_v62 = vpop.xlane.xlu0 %280  ;;  %v620_v56 = vadd.s32 4294967192, %v1112_v27  ;;  %v627_v59 = vadd.s32 4294967184, %v1112_v27 }
  0xd3   :  { %v563_v63 = vsel %vm562_vm3, %v561_v58, %v556_v45  ;;  %v399_v0 = vmul.f32 0.00390625, %v281_v62  ;;  %v1195_v58 = vsub.s32 %v585_v44, %v1114_v30  ;;  %v1201_v62 = vsub.s32 %v592_v46, %v1114_v30 }
  0xd4   :  { %v826_v1 = vrot.slane %v416_v61, %v567_v48 }
  0xd5   :  { %v742_v3 = vrot.slane %v399_v0, %v560_v29  ;;  %v239_v4 = vpop.xlane.xlu1 %238 }
  0xd6   :  { %v1149_v5 = vsel %vm569_vm4, %v826_v1, %v822_v51  ;;  %v385_v6 = vmul.f32 0.00390625, %v239_v4  ;;  %v188_v7 = vpop.xlane.xlu0 %187  ;;  %v613_v51 = vadd.s32 4294967200, %v1112_v27 }
  0xd7   :  { %v743_v8 = vsel %vm562_vm3, %v742_v3, %v738_v54  ;;  %v368_v9 = vmul.f32 0.00390625, %v188_v7  ;;  %v1208_v3 = vsub.s32 %v606_v50, %v1114_v30 }
  0xd8   :  { %v673_v10 = vrot.slane %v385_v6, %v1146_v2  ;;  %v1211_v4 = vsub.s32 %v613_v51, %v1114_v30 }
  0xd9   :  { %v568_v11 = vrot.slane %v368_v9, %v567_v48  ;;  %v335_v12 = vpop.xlane.xlu1 %334  ;;  %v1218_v9 = vsub.s32 %v620_v56, %v1114_v30 }
  0xda   :  { %v1154_v13 = vsel %vm576_vm5, %v673_v10, %v669_v60  ;;  %v284_v14 = vpop.xlane.xlu0 %283  ;;  %v417_v45 = vmul.f32 0.00390625, %v335_v12  ;;  %v634_v60 = vadd.s32 4294967176, %v1112_v27 }
  0xdb   :  { %v1157_v15 = vsel %vm569_vm4, %v568_v11, %v563_v63  ;;  %v400_v16 = vmul.f32 0.00390625, %v284_v14  ;;  %v1204_v63 = vsub.s32 %v599_v47, %v1114_v30  ;;  %v1224_v14 = vsub.s32 %v627_v59, %v1114_v30 }
  0xdc   :  { %v831_v61 = vrot.slane %v417_v45, %v1146_v2 }
  0xdd   :  { %v747_v17 = vrot.slane %v400_v16, %v567_v48  ;;  %v242_v18 = vpop.xlane.xlu1 %241  ;;  %v1185_v48 = vsub.s32 %v578_v41, %v1114_v30  ;;  %v1227_v16 = vsub.s32 %v634_v60, %v1114_v30 }
  0xde   :  { %v191_v19 = vpop.xlane.xlu0 %190  ;;  %v386_v49 = vmul.f32 0.00390625, %v242_v18 }
  0xdf   :  { %v1160_v20 = vsel %vm569_vm4, %v747_v17, %v743_v8  ;;  %v369_v53 = vmul.f32 0.00390625, %v191_v19  ;;  %v832_v17 = vsel %vm576_vm5, %v831_v61, %v1149_v5 }
  0xe0   :  { %v678_v0 = vrot.slane %v386_v49, %v1185_v48 }
  0xe1   :  { %v338_v21 = vpop.xlane.xlu1 %337  ;;  %v575_v6 = vrot.slane %v369_v53, %v1146_v2 }
  0xe2   :  { %v287_v22 = vpop.xlane.xlu0 %286  ;;  %v418_v54 = vmul.f32 0.00390625, %v338_v21 }
  0xe3   :  { %v401_v57 = vmul.f32 0.00390625, %v287_v22  ;;  %v679_v22 = vsel %vm583_vm6, %v678_v0, %v1154_v13  ;;  %v577_v41 = vsel %vm576_vm5, %v575_v6, %v1157_v15 }
  0xe4   :  { %v836_v7 = vrot.slane %v418_v54, %v1185_v48 }
  0xe5   :  { %v245_v23 = vpop.xlane.xlu1 %244  ;;  %v752_v11 = vrot.slane %v401_v57, %v1146_v2 }
  0xe6   :  { %v194_v24 = vpop.xlane.xlu0 %193  ;;  %v387_v1 = vmul.f32 0.00390625, %v245_v23  ;;  %v837_v30 = vsel %vm583_vm6, %v836_v7, %v832_v17 }
  0xe7   :  { %v370_v8 = vmul.f32 0.00390625, %v194_v24 }
  0xe8   :  { %v683_v23 = vrot.slane %v387_v1, %v1195_v58 }
  0xe9   :  { %v341_v25 = vpop.xlane.xlu1 %340  ;;  %v582_v44 = vrot.slane %v370_v8, %v1185_v48 }
  0xea   :  { %v290_v26 = vpop.xlane.xlu0 %289  ;;  %v419_v12 = vmul.f32 0.00390625, %v341_v25 }
  0xeb   :  { %v402_v18 = vmul.f32 0.00390625, %v290_v26  ;;  %v753_v26 = vsel %vm576_vm5, %v752_v11, %v1160_v20 }
  0xec   :  { %v841_v13 = vrot.slane %v419_v12, %v1195_v58 }
  0xed   :  { %v248_v28 = vpop.xlane.xlu1 %247 }
  0xee   :  { %v197_v29 = vpop.xlane.xlu0 %196  ;;  %v388_v19 = vmul.f32 0.00390625, %v248_v28 }
  0xef   :  { %v371_v21 = vmul.f32 0.00390625, %v197_v29 }
  0xf0   :  { %v688_v15 = vrot.slane %v388_v19, %v1201_v62 }
  0xf1   :  { %v344_v31 = vpop.xlane.xlu1 %343 }
  0xf2   :  { %v293_v32 = vpop.xlane.xlu0 %292  ;;  %v420_v2 = vmul.f32 0.00390625, %v344_v31  ;;  %v757_v31 = vrot.slane %v402_v18, %v1185_v48 }
  0xf3   :  { %v403_v24 = vmul.f32 0.00390625, %v293_v32  ;;  %v589_v32 = vrot.slane %v371_v21, %v1195_v58 }
  0xf4   :  { %v846_v47 = vrot.slane %v420_v2, %v1201_v62 }
  0xf5   :  { %v251_v33 = vpop.xlane.xlu1 %250  ;;  %v762_v20 = vrot.slane %v403_v24, %v1195_v58 }
  0xf6   :  { %v1162_v34 = vpop.xlane.xlu0 %199  ;;  %v389_v45 = vmul.f32 0.00390625, %v251_v33  ;;  %v684_v33 = vsel %vm590_vm7, %v683_v23, %v679_v22 }
  0xf7   :  { %v372_v28 = vmul.f32 0.00390625, %v1162_v34  ;;  %v584_v34 = vsel %vm583_vm6, %v582_v44, %v577_v41  ;;  %v689_v58 = vsel %vm597_vm8, %v688_v15, %v684_v33 }
  0xf8   :  { %v591_v59 = vsel %vm590_vm7, %v589_v32, %v584_v34 }
  0xf9   :  { %v1164_v35 = vpop.xlane.xlu1 %346  ;;  %v596_v54 = vrot.slane %v372_v28, %v1201_v62 }
  0xfa   :  { %v1166_v36 = vpop.xlane.xlu0 %295  ;;  %v421_v29 = vmul.f32 0.00390625, %v1164_v35  ;;  %v693_v35 = vrot.slane %v389_v45, %v1204_v63 }
  0xfb   :  { %v404_v46 = vmul.f32 0.00390625, %v1166_v36  ;;  %v842_v36 = vsel %vm590_vm7, %v841_v13, %v837_v30 }
  0xfc   :  { %v851_v56 = vrot.slane %v421_v29, %v1204_v63 }
  0xfd   :  { %v1168_v37 = vpop.xlane.xlu1 %253 }
  0xfe   :  { %v1170_v38 = vpop.xlane.xlu0 %202  ;;  %v390_v49 = vmul.f32 0.00390625, %v1168_v37  ;;  %v758_v37 = vsel %vm583_vm6, %v757_v31, %v753_v26 }
  0xff   :  { %v373_v48 = vmul.f32 0.00390625, %v1170_v38  ;;  %v767_v38 = vrot.slane %v404_v46, %v1201_v62  ;;  %v763_v60 = vsel %vm590_vm7, %v762_v20, %v758_v37  ;;  %v598_v62 = vsel %vm597_vm8, %v596_v54, %v591_v59 }
 0x100   :  { %v698_v61 = vrot.slane %v390_v49, %v1208_v3 }
 0x101   :  { %v1172_v39 = vpop.xlane.xlu1 %349  ;;  %v603_v6 = vrot.slane %v373_v48, %v1204_v63  ;;  %v768_v18 = vsel %vm597_vm8, %v767_v38, %v763_v60 }
 0x102   :  { %v1174_v40 = vpop.xlane.xlu0 %298  ;;  %v422_v51 = vmul.f32 0.00390625, %v1172_v39  ;;  %v847_v39 = vsel %vm597_vm8, %v846_v47, %v842_v36 }
 0x103   :  { %v405_v57 = vmul.f32 0.00390625, %v1174_v40  ;;  %v694_v40 = vsel %vm604_vm9, %v693_v35, %v689_v58  ;;  %v852_v12 = vsel %vm604_vm9, %v851_v56, %v847_v39 }
 0x104   :  { %v856_v7 = vrot.slane %v422_v51, %v1208_v3 }
 0x105   :  { %v1177_v42 = vpop.xlane.xlu1 %256  ;;  %v772_v17 = vrot.slane %v405_v57, %v1204_v63  ;;  %v605_v63 = vsel %vm604_vm9, %v603_v6, %v598_v62 }
 0x106   :  { %v1179_v43 = vpop.xlane.xlu0 %205  ;;  %v391_v0 = vmul.f32 0.00390625, %v1177_v42 }
 0x107   :  { %v374_v19 = vmul.f32 0.00390625, %v1179_v43  ;;  %v773_v43 = vsel %vm604_vm9, %v772_v17, %v768_v18 }
 0x108   :  { %v703_v23 = vrot.slane %v391_v0, %v1211_v4 }
 0x109   :  { %v1189_v52 = vpop.xlane.xlu1 %352  ;;  %v610_v13 = vrot.slane %v374_v19, %v1208_v3 }
 0x10a   :  { %v1191_v55 = vpop.xlane.xlu0 %301  ;;  %v423_v8 = vmul.f32 0.00390625, %v1189_v52  ;;  %v699_v52 = vsel %vm611_vm10, %v698_v61, %v694_v40 }
 0x10b   :  { %v406_v42 = vmul.f32 0.00390625, %v1191_v55  ;;  %v857_v55 = vsel %vm611_vm10, %v856_v7, %v852_v12  ;;  %v704_v15 = vsel %vm618_vm11, %v703_v23, %v699_v52  ;;  %v612_v0 = vsel %vm611_vm10, %v610_v13, %v605_v63 }
 0x10c   :  { %v861_v30 = vrot.slane %v423_v8, %v1211_v4 }
 0x10d   :  { %v1213_v27 = vpop.xlane.xlu1 %259 }
 0x10e   :  { %v1220_v10 = vpop.xlane.xlu0 %208  ;;  %v392_v21 = vmul.f32 0.00390625, %v1213_v27  ;;  %v777_v27 = vrot.slane %v406_v42, %v1208_v3  ;;  %v862_v20 = vsel %vm618_vm11, %v861_v30, %v857_v55 }
 0x110   :  { %v708_v28 = vrot.slane %v392_v21, %v1218_v9  ;;  %v970_v21 = vld [vmem:[%s1329_s2] ss:$0 sm:$0xff] }
 0x111   :  { %v356_v25 = vpop.xlane.xlu1 %355 }
 0x112   :  { %v305_v5 = vpop.xlane.xlu0 %304  ;;  %v424_v22 = vmul.f32 0.00390625, %v356_v25  ;;  %v375_v25 = vmul.f32 0.00390625, %v1220_v10  ;;  %v709_v36 = vsel %vm625_vm12, %v708_v28, %v704_v15 }
 0x113   :  { %v407_v26 = vmul.f32 0.00390625, %v305_v5 }
 0x114   :  { %v866_v29 = vrot.slane %v424_v22, %v1218_v9  ;;  %v617_v34 = vrot.slane %v375_v25, %v1211_v4 }
 0x115   :  { %v263_v50 = vpop.xlane.xlu1 %262  ;;  %v782_v35 = vrot.slane %v407_v26, %v1211_v4 }
 0x116   :  { %v212_v53 = vpop.xlane.xlu0 %211  ;;  %v393_v2 = vmul.f32 0.00390625, %v263_v50  ;;  %v778_v50 = vsel %vm611_vm10, %v777_v27, %v773_v43  ;;  %v867_v54 = vsel %vm625_vm12, %v866_v29, %v862_v20  ;;  %v619_v6 = vsel %vm618_vm11, %v617_v34, %v612_v0 }
 0x117   :  { %v376_v46 = vmul.f32 0.00390625, %v212_v53 }
 0x118   :  { %v713_v32 = vrot.slane %v393_v2, %v1224_v14 }
 0x119   :  { %v359_v1 = vpop.xlane.xlu1 %358  ;;  %v624_v56 = vrot.slane %v376_v46, %v1218_v9 }
 0x11a   :  { %v308_v11 = vpop.xlane.xlu0 %307  ;;  %v425_v24 = vmul.f32 0.00390625, %v359_v1  ;;  %v714_v58 = vsel %vm632_vm13, %v713_v32, %v709_v36  ;;  %v783_v1 = vsel %vm618_vm11, %v782_v35, %v778_v50 }
 0x11b   :  { %v408_v31 = vmul.f32 0.00390625, %v308_v11 }
 0x11c   :  { %v871_v33 = vrot.slane %v425_v24, %v1224_v14 }
 0x11d   :  { %v266_v41 = vpop.xlane.xlu1 %265  ;;  %v787_v51 = vrot.slane %v408_v31, %v1218_v9 }
 0x11e   :  { %v394_v44 = vmul.f32 0.00390625, %v266_v41  ;;  %v215_v45 = vpop.xlane.xlu0 %214  ;;  %v872_v59 = vsel %vm632_vm13, %v871_v33, %v867_v54 }
 0x11f   :  { %v377_v5 = vmul.f32 0.00390625, %v215_v45  ;;  %v788_v7 = vsel %vm625_vm12, %v787_v51, %v783_v1 }
 0x120   :  { %v718_v10 = vrot.slane %v394_v44, %v1227_v16 }
 0x121   :  { %v362_v47 = vpop.xlane.xlu1 %361  ;;  %v631_v4 = vrot.slane %v377_v5, %v1224_v14 }
 0x122   :  { %v426_v49 = vmul.f32 0.00390625, %v362_v47  ;;  %v311_v3 = vpop.xlane.xlu0 %310  ;;  %v719_v60 = vsel %vm639_vm14, %v718_v10, %v714_v58 }
 0x123   :  { %v409_v48 = vmul.f32 0.00390625, %v311_v3 }
 0x124   :  { %v876_v53 = vrot.slane %v426_v49, %v1227_v16 }
 0x125   :  { %v792_v57 = vrot.slane %v409_v48, %v1224_v14  ;;  %v314_v37 = vpop.xlane.xlu1 %313  ;;  %v626_v14 = vsel %vm625_vm12, %v624_v56, %v619_v6 }
 0x126   :  { %v410_v38 = vmul.f32 0.00390625, %v314_v37  ;;  %v218_v39 = vpop.xlane.xlu0 %217  ;;  %v877_v61 = vsel %vm639_vm14, %v876_v53, %v872_v59  ;;  %v633_v12 = vsel %vm632_vm13, %v631_v4, %v626_v14 }
 0x127   :  { %v378_v9 = vmul.f32 0.00390625, %v218_v39  ;;  %v880_v40 = vsel %vm878_vm15, %v877_v61, %v719_v60  ;;  %v793_v62 = vsel %vm632_vm13, %v792_v57, %v788_v7 }
 0x128   :  { %v797_v8 = vrot.slane %v410_v38, %v1227_v16  ;;  %947 = vmatprep.mubr.f32.mxu0 %v880_v40 }
 0x129   :  { %v638_v11 = vrot.slane %v378_v9, %v1227_v16 }
 0x12a   :  { %v798_v17 = vsel %vm639_vm14, %v797_v8, %v793_v62 }
 0x12b   :  { %v640_v42 = vsel %vm639_vm14, %v638_v11, %v633_v12 }
 0x12c   :  { %v879_v18 = vsel %vm878_vm15, %v798_v17, %v640_v42 }
 0x12d   :  { %948 = vmatmul.mubr.f32.vlgmr.msra.gmra.mxu0 %v879_v18 }
 0x1ed   :  { %v1003_v19 = vpop.f32.mrf.mxu0 }
 0x1ef   :  { %v1004_v22 = vpop.f32.mrf.mxu0 }
 0x1f0   :  { %v1005_v16 = vadd.f32 %v1004_v22, %v1003_v19 }
 0x1f2   :  { %v950_v52 = vadd.f32 %v1005_v16, %v970_v21 }
 0x1f4   :  { %953 = vst [vmem:[#allocation7] sm:$0x3] %v950_v52 }
 0x1f5   :  { %1064 = shalt.err (!%p1061_p0)
}
 0x1f6   :  { %963 = dma.vmem_to_hbm [thread:$0]  %s961_s27, 32, %s1330_s3, [#allocation4]  }
 0x1f7   :  { %1077 = dma.done.wait [#allocation4], 32  }
 0x1f8   :  { %1078 = vsyncadd [#allocation4], 4294967264 }
 0x1f9   :  { %967 = vsyncpa [#allocation3], 1 }
 0x1fa   :  { %968 = vsyncpa [#allocation6], 1 }
 0x1fb   :  { %969 = vsyncpa [#allocation4], 1 }

</bundles_post_ra>
